<compile_context>
chip_gen: v7x
topology: tpu7x:2x2x1
jax: 0.10.0
libtpu: 0.0.40
codegen_flags: <defaults>
</compile_context>

<pallas_src>
import functools

import jax
import jax.numpy as jnp
from jax import lax
from jax.experimental import pallas as pl
from jax.experimental.pallas import tpu as pltpu

LANES = 128
MAX_TILE_ROWS = 2048  # (2048, 128) f32 block = 1 MiB per input; 2 in x 2 bufs = 4 MiB VMEM


def _focal_partial_kernel(p_ref, t_ref, out_ref, *, alpha, gamma,
                          tile_rows, num_tiles, valid_in_last):
    """Per-tile partial focal-loss sum, folded into an (8, 128) slab."""
    p = p_ref[...].astype(jnp.float32)
    t = t_ref[...].astype(jnp.float32)

    # Hard-label assumption: t in {0, 1}.
    is_pos = t > 0.5
    p_sel = jnp.where(is_pos, p, 1.0 - p)
    bce = -jnp.maximum(jnp.log(p_sel), -100.0)   # PyTorch BCE clamps logs at -100
    pt = p_sel                                    # == exp(-bce) up to the clamp
    at = jnp.where(is_pos, 1.0 - alpha, alpha)

    one_minus_pt = 1.0 - pt
    g = float(gamma)
    if g == int(g) and 0 <= int(g) <= 8:
        mod = jnp.ones_like(one_minus_pt)
        for _ in range(int(g)):                   # VPU multiplies, no exp/log for pow
            mod = mod * one_minus_pt
    else:
        mod = one_minus_pt ** g

    f_loss = at * mod * bce

    # Mask the padded tail — generated in-kernel, only when padding exists
    # (static Python check) and only effective on the last grid step.
    tile_elems = tile_rows * LANES
    if valid_in_last < tile_elems:
        row = lax.broadcasted_iota(jnp.int32, (tile_rows, LANES), 0)
        lane = lax.broadcasted_iota(jnp.int32, (tile_rows, LANES), 1)
        flat = row * LANES + lane
        limit = jnp.where(pl.program_id(0) == num_tiles - 1,
                          jnp.int32(valid_in_last), jnp.int32(tile_elems))
        f_loss = jnp.where(flat < limit, f_loss, 0.0)

    # Fold (tile_rows, 128) -> (8, 128) with pure VPU adds (tile_rows % 8 == 0),
    # then a lane-dense (1, 8, 128) store.
    partial = f_loss.reshape(tile_rows // 8, 8, LANES).sum(axis=0)
    out_ref[...] = partial.reshape(1, 8, LANES)


def weighted_focal_loss(preds, targets, alpha=0.01, gamma=2):
    """Pallas implementation of WeightedFocalLoss.forward (returns scalar f32)."""
    n = preds.size
    p_flat = preds.reshape(-1).astype(jnp.float32)
    t_flat = targets.reshape(-1).astype(jnp.float32)

    rows = pl.cdiv(n, LANES)
    rows8 = ((rows + 7) // 8) * 8                 # keep sublane alignment
    if rows8 <= MAX_TILE_ROWS:
        tile_rows = rows8
        num_tiles = 1
    else:
        tile_rows = MAX_TILE_ROWS
        num_tiles = pl.cdiv(rows8, tile_rows)
    padded_rows = num_tiles * tile_rows
    n_pad = padded_rows * LANES
    pad = n_pad - n
    if pad:  # only materialize a padded copy when shapes actually require it
        p_flat = jnp.pad(p_flat, (0, pad), constant_values=0.5)
        t_flat = jnp.pad(t_flat, (0, pad), constant_values=0.0)

    p2 = p_flat.reshape(padded_rows, LANES)
    t2 = t_flat.reshape(padded_rows, LANES)

    valid_in_last = n - (num_tiles - 1) * tile_rows * LANES

    kernel = functools.partial(
        _focal_partial_kernel, alpha=float(alpha), gamma=gamma,
        tile_rows=tile_rows, num_tiles=num_tiles, valid_in_last=valid_in_last)

    in_spec = pl.BlockSpec((tile_rows, LANES), lambda i: (i, 0))
    partials = pl.pallas_call(
        kernel,
        out_shape=jax.ShapeDtypeStruct((num_tiles, 8, LANES), jnp.float32),
        grid_spec=pltpu.PrefetchScalarGridSpec(
            num_scalar_prefetch=0,
            grid=(num_tiles,),
            in_specs=[in_spec, in_spec],
            out_specs=pl.BlockSpec((1, 8, LANES), lambda i: (i, 0, 0)),
        ),
        compiler_params=pltpu.CompilerParams(
            dimension_semantics=("parallel",)),   # megacore-shardable on v7x
    )(p2, t2)

    loss = jnp.sum(partials) / jnp.float32(n)
    # NaN/Inf guard -> 0 (PyTorch returns zeros(1); we return scalar 0.0).
    loss = jnp.where(jnp.isnan(loss) | jnp.isinf(loss), jnp.float32(0.0), loss)
    return loss


def _reference(preds, targets, alpha=0.01, gamma=2):
    """PyTorch-faithful formula (two logs + exp + pow) in plain JAX."""
    p = preds.reshape(-1).astype(jnp.float32)
    t = targets.reshape(-1).astype(jnp.float32)
    bce = -(t * jnp.maximum(jnp.log(p), -100.0)
            + (1.0 - t) * jnp.maximum(jnp.log(1.0 - p), -100.0))
    at = alpha * (1.0 - t) + (1.0 - alpha) * t
    pt = jnp.exp(-bce)
    f = at * (1.0 - pt) ** gamma * bce
    loss = jnp.mean(f)
    return jnp.where(jnp.isnan(loss) | jnp.isinf(loss), 0.0, loss)


if __name__ == "__main__":
    key = jax.random.PRNGKey(0)
    kp, kt = jax.random.split(key)

    # NCHW inputs, preds are probabilities in (0, 1), targets are hard {0, 1}.
    B, C, H, W = 2, 4, 16, 16
    preds = jax.nn.sigmoid(jax.random.normal(kp, (B, C, H, W), jnp.float32))
    targets = (jax.random.uniform(kt, (B, C, H, W)) > 0.5).astype(jnp.float32)

    out = weighted_focal_loss(preds, targets, alpha=0.01, gamma=2)
    out = jax.block_until_ready(out)

    ref = _reference(preds, targets, alpha=0.01, gamma=2)
    assert jnp.allclose(out, ref, rtol=1e-5, atol=1e-6), (out, ref)

    print("KERNEL_OK")
</pallas_src>

<mosaic_0001>
module attributes {stable_mosaic.version = 11 : i64} {
  func.func @_focal_partial_kernel(%arg0: i32, %arg1: memref<16x128xf32, #tpu.memory_space<vmem>>, %arg2: memref<16x128xf32, #tpu.memory_space<vmem>>, %arg3: memref<1x8x128xf32, #tpu.memory_space<vmem>>) attributes {dimension_semantics = [#tpu.dimension_semantics<parallel>], iteration_bounds = array<i64: 1>, scalar_prefetch = 0 : i64, scratch_operands = 0 : i64, tpu.core_type = #tpu.core_type<tc>, window_params = [{transform_indices = @transform_0, window_bounds = array<i64: 16, 128>}, {transform_indices = @transform_1, window_bounds = array<i64: 16, 128>}, {transform_indices = @transform_2, window_bounds = array<i64: 1, 8, 128>}]} {
    %c0 = arith.constant 0 : index
    %c0_0 = arith.constant 0 : index
    %0 = vector.load %arg1[%c0, %c0_0] : memref<16x128xf32, #tpu.memory_space<vmem>>, vector<16x128xf32>
    %c0_1 = arith.constant 0 : index
    %c0_2 = arith.constant 0 : index
    %1 = vector.load %arg2[%c0_1, %c0_2] : memref<16x128xf32, #tpu.memory_space<vmem>>, vector<16x128xf32>
    %cst = arith.constant 5.000000e-01 : f32
    %2 = vector.broadcast %cst : f32 to vector<16x128xf32>
    %3 = arith.cmpf ogt, %1, %2 : vector<16x128xf32>
    %cst_3 = arith.constant 1.000000e+00 : f32
    %4 = vector.broadcast %cst_3 : f32 to vector<16x128xf32>
    %5 = arith.subf %4, %0 : vector<16x128xf32>
    %6 = arith.select %3, %0, %5 : vector<16x128xi1>, vector<16x128xf32>
    %7 = math.log %6 : vector<16x128xf32>
    %cst_4 = arith.constant -1.000000e+02 : f32
    %8 = vector.broadcast %cst_4 : f32 to vector<16x128xf32>
    %9 = arith.maximumf %7, %8 : vector<16x128xf32>
    %cst_5 = arith.constant 0.000000e+00 : f32
    %10 = vector.broadcast %cst_5 : f32 to vector<16x128xf32>
    %11 = arith.subf %10, %9 : vector<16x128xf32>
    %cst_6 = arith.constant 9.900000e-01 : f32
    %cst_7 = arith.constant 0.00999999977 : f32
    %12 = vector.broadcast %cst_6 : f32 to vector<16x128xf32>
    %13 = vector.broadcast %cst_7 : f32 to vector<16x128xf32>
    %14 = arith.select %3, %12, %13 : vector<16x128xi1>, vector<16x128xf32>
    %cst_8 = arith.constant 1.000000e+00 : f32
    %15 = vector.broadcast %cst_8 : f32 to vector<16x128xf32>
    %16 = arith.subf %15, %6 : vector<16x128xf32>
    %cst_9 = arith.constant 1.000000e+00 : f32
    %17 = vector.broadcast %cst_9 : f32 to vector<16x128xf32>
    %18 = arith.mulf %17, %16 : vector<16x128xf32>
    %19 = arith.mulf %18, %16 : vector<16x128xf32>
    %20 = arith.mulf %14, %19 : vector<16x128xf32>
    %21 = arith.mulf %20, %11 : vector<16x128xf32>
    %22 = vector.shape_cast %21 : vector<16x128xf32> to vector<2x8x128xf32>
    %cst_10 = arith.constant dense<0.000000e+00> : vector<8x128xf32>
    %23 = vector.multi_reduction <add>, %22, %cst_10 [0] : vector<2x8x128xf32> to vector<8x128xf32>
    %24 = vector.shape_cast %23 : vector<8x128xf32> to vector<1x8x128xf32>
    %c0_11 = arith.constant 0 : index
    %c0_12 = arith.constant 0 : index
    %c0_13 = arith.constant 0 : index
    %25 = vector.load %arg3[%c0_11, %c0_12, %c0_13] : memref<1x8x128xf32, #tpu.memory_space<vmem>>, vector<1x8x128xf32>
    tpu.vector_store %arg3[%c0_11, %c0_12, %c0_13], %24 {strides = array<i32>} : memref<1x8x128xf32, #tpu.memory_space<vmem>>, vector<1x8x128xf32>,
    return
  }
  func.func @transform_0(%arg0: i32) -> (i32, i32) {
    %c0_i32 = arith.constant 0 : i32
    %c0_i32_0 = arith.constant 0 : i32
    return %arg0, %c0_i32 : i32, i32
  }
  func.func @transform_1(%arg0: i32) -> (i32, i32) {
    %c0_i32 = arith.constant 0 : i32
    %c0_i32_0 = arith.constant 0 : i32
    return %arg0, %c0_i32 : i32, i32
  }
  func.func @transform_2(%arg0: i32) -> (i32, i32, i32) {
    %c0_i32 = arith.constant 0 : i32
    %c0_i32_0 = arith.constant 0 : i32
    %c0_i32_1 = arith.constant 0 : i32
    return %arg0, %c0_i32, %c0_i32_0 : i32, i32, i32
  }
}

</mosaic_0001>

<bundles_post_ra>
// kernel: tpu_custom_call.1
= control target key start
LH: loop header
LB: loop body
LE: loop exit
PB: predicated region body
PF: predicated region fallthrough
CT: control target
= control target key end

     0   :  { %7 = vsyncpa [#allocation3], 0  ;;  %s225_s0 = inlined_call_operand.hbm [shape: f32[16,128], index: 0, kind: input, shape index: {}]   ;;  %s226_s1 = inlined_call_operand.hbm [shape: f32[16,128], index: 1, kind: input, shape index: {}]   ;;  %s227_s2 = inlined_call_operand.hbm [shape: f32[1,8,128], index: 2, kind: output, shape index: {}]  }
   0x1   :  { %8 = vsyncpa [#allocation6], 0 }
   0x2   :  { %9 = vsyncpa [#allocation4], 0  ;;  %s168_s9 = smov [#allocation2]   ;;  %s96_s13 = scalar_lea.hbm %s225_s0, 256 }
   0x3   :  { %s15_s10 = sshll.u32 %s168_s9, 4  ;;  %p97_p0 = scmp.ne.s32.totalorder %s225_s0, %s96_s13  ;;  %s16_s10 = int_to_ptr.vmem [resolvable:$true] %s15_s10 }
   0x4   :  { %p100_p1 = scmp.lt.u32.totalorder %s96_s13, %s225_s0 }
   0x6   :  { %p102_p2 = pnand %p100_p1, %p97_p0 }
   0x8   :  { %105 = shalt.err (!%p102_p2)
}
   0x9   :  { %s106_s18 = scalar_lea.vmem %s16_s10, 256  ;;  %p111_p4 = scmp.lt.s32.totalorder %s16_s10, %s16_s10 }
   0xa   :  { %p107_p3 = scmp.ne.s32.totalorder %s16_s10, %s106_s18  ;;  %p112_p5 = scmp.lt.s32.totalorder %s106_s18, %s106_s18 }
   0xc   :  { %p113_p6 = por %p112_p5, %p111_p4 }
   0xe   :  { %p114_p7 = pnand %p113_p6, %p107_p3 }
  0x10   :  { %117 = shalt.err (!%p114_p7)
}
  0x11   :  { %s169_s19 = smov 128   ;;  %s170_s20 = smov 8  }
  0x12   :  { %21 = dma.hbm_to_vmem [thread:$0]  %s225_s0, 256, %s16_s10, [#allocation3], %s169_s19, %s169_s19, %s170_s20  }
  0x13   :  { %s171_s23 = smov [#allocation5]   ;;  %s118_s27 = scalar_lea.hbm %s226_s1, 256 }
  0x14   :  { %s27_s24 = sshll.u32 %s171_s23, 4  ;;  %p119_p8 = scmp.ne.s32.totalorder %s226_s1, %s118_s27  ;;  %s28_s24 = int_to_ptr.vmem [resolvable:$true] %s27_s24 }
  0x15   :  { %p122_p9 = scmp.lt.u32.totalorder %s118_s27, %s226_s1 }
  0x17   :  { %p124_p10 = pnand %p122_p9, %p119_p8 }
  0x19   :  { %127 = shalt.err (!%p124_p10)
}
  0x1a   :  { %s128_s4 = scalar_lea.vmem %s28_s24, 256  ;;  %p133_p12 = scmp.lt.s32.totalorder %s28_s24, %s28_s24 }
  0x1b   :  { %p129_p11 = scmp.ne.s32.totalorder %s28_s24, %s128_s4  ;;  %p134_p13 = scmp.lt.s32.totalorder %s128_s4, %s128_s4 }
  0x1d   :  { %p135_p0 = por %p134_p13, %p133_p12 }
  0x1f   :  { %p136_p1 = pnand %p135_p0, %p129_p11 }
  0x21   :  { %139 = shalt.err (!%p136_p1)
}
  0x22   :  { %33 = dma.hbm_to_vmem [thread:$0]  %s226_s1, 256, %s28_s24, [#allocation6], %s169_s19, %s169_s19, %s170_s20  }
  0x23   :  { %162 = dma.done.wait [#allocation3], 256  }
  0x24   :  { %163 = vsyncadd [#allocation3], 4294967040 }
  0x25   :  { %164 = dma.done.wait [#allocation6], 256  }
  0x26   :  { %165 = vsyncadd [#allocation6], 4294967040  ;;  %v40_v0 = vld [vmem:[#allocation2] sm:$0xff]  ;;  %v41_v1 = vld [vmem:[#allocation2 + $0x8] sm:$0xff]  ;;  %v172_v12 = vmov 0.01  }
  0x27   :  { %v42_v2 = vld [vmem:[#allocation5] sm:$0xff]  ;;  %v43_v3 = vld [vmem:[#allocation5 + $0x8] sm:$0xff]  ;;  %v46_v4 = vsub.f32 1.0, %v40_v0  ;;  %v47_v5 = vsub.f32 1.0, %v41_v1  ;;  %s173_s1 = smov [#allocation7]  }
  0x28   :  { %vm44_vm0 = vcmp.gt.f32.partialorder %v42_v2, 0.5  ;;  %vm45_vm1 = vcmp.gt.f32.partialorder %v43_v3, 0.5  ;;  %s76_s6 = sshll.u32 %s173_s1, 4  ;;  %s77_s6 = int_to_ptr.vmem [resolvable:$true] %s76_s6 }
  0x29   :  { %v48_v6 = vsel %vm44_vm0, %v40_v0, %v46_v4  ;;  %v49_v7 = vsel %vm45_vm1, %v41_v1, %v47_v5  ;;  %v58_v13 = vsel %vm44_vm0, 0.99, %v172_v12  ;;  %v59_v17 = vsel %vm45_vm1, 0.99, %v172_v12  ;;  %s140_s7 = scalar_lea.vmem %s77_s6, 128  ;;  %p145_p3 = scmp.lt.s32.totalorder %s77_s6, %s77_s6 }
  0x2a   :  { %92 = vlog2.f32 %v48_v6  ;;  %v60_v8 = vsub.f32 1.0, %v48_v6  ;;  %v61_v9 = vsub.f32 1.0, %v49_v7  ;;  %p141_p2 = scmp.ne.s32.totalorder %s77_s6, %s140_s7  ;;  %p146_p4 = scmp.lt.s32.totalorder %s140_s7, %s140_s7 }
  0x2b   :  { %94 = vlog2.f32 %v49_v7 }
  0x2c   :  { %v62_v10 = vmul.f32 %v60_v8, %v60_v8  ;;  %v63_v14 = vmul.f32 %v61_v9, %v61_v9  ;;  %p147_p5 = por %p146_p4, %p145_p3 }
  0x2e   :  { %v64_v20 = vmul.f32 %v62_v10, %v58_v13  ;;  %v65_v22 = vmul.f32 %v63_v14, %v59_v17  ;;  %p148_p6 = pnand %p147_p5, %p141_p2 }
  0x34   :  { %v93_v11 = vpop.eup %92 }
  0x35   :  { %v95_v15 = vpop.eup %94  ;;  %v51_v16 = vmul.f32 0.6931472, %v93_v11 }
  0x36   :  { %v53_v18 = vmul.f32 0.6931472, %v95_v15 }
  0x37   :  { %v54_v19 = vmax.f32 %v51_v16, -100.0 }
  0x38   :  { %v55_v21 = vmax.f32 %v53_v18, -100.0 }
  0x39   :  { %v56_v23 = vsub.f32 0.0, %v54_v19 }
  0x3a   :  { %v57_v24 = vsub.f32 0.0, %v55_v21 }
  0x3b   :  { %v66_v25 = vmul.f32 %v64_v20, %v56_v23 }
  0x3c   :  { %v67_v26 = vmul.f32 %v65_v22, %v57_v24 }
  0x3e   :  { %v68_v27 = vadd.f32 %v67_v26, %v66_v25 }
  0x40   :  { %69 = vst [vmem:[#allocation7] sm:$0xff] %v68_v27 }
  0x41   :  { %151 = shalt.err (!%p148_p6)
}
  0x42   :  { %s152_s10 = scalar_lea.hbm %s227_s2, 128 }
  0x43   :  { %p153_p7 = scmp.ne.s32.totalorder %s227_s2, %s152_s10  ;;  %p156_p8 = scmp.lt.u32.totalorder %s152_s10, %s227_s2 }
  0x45   :  { %p158_p9 = pnand %p156_p8, %p153_p7 }
  0x47   :  { %161 = shalt.err (!%p158_p9)
}
  0x48   :  { %79 = dma.vmem_to_hbm [thread:$0]  %s77_s6, 128, %s227_s2, [#allocation4]  }
  0x49   :  { %166 = dma.done.wait [#allocation4], 128  }
  0x4a   :  { %167 = vsyncadd [#allocation4], 4294967168 }
  0x4b   :  { %83 = vsyncpa [#allocation3], 1 }
  0x4c   :  { %84 = vsyncpa [#allocation6], 1 }
  0x4d   :  { %85 = vsyncpa [#allocation4], 1 }

</bundles_post_ra>
